<compile_context>
chip_gen: v5e
topology: v5e:2x2
jax: 0.10.0
libtpu: 0.0.40
codegen_flags: <defaults>
</compile_context>

<pallas_src>
import functools

import jax
import jax.numpy as jnp
from jax.experimental import pallas as pl
from jax.experimental.pallas import tpu as pltpu


def _round_up(x: int, m: int) -> int:
    return ((x + m - 1) // m) * m


def _fit_tile(dim: int, max_tile: int, granularity: int) -> int:
    """Largest tile <= max_tile that is a multiple of `granularity` and divides
    `dim` (dim must already be a multiple of granularity).  Never rounds the
    problem up — avoids phantom rows/cols."""
    if dim <= max_tile:
        return dim
    q = dim // granularity
    for cand in range(max_tile // granularity, 0, -1):
        if q % cand == 0:
            return cand * granularity
    return granularity


# ----------------------------------------------------------------------------
# Kernels
# ----------------------------------------------------------------------------
def _decoder_kernel_single_k(x_ref, w_ref, b_ref, o_ref, *, compute_dtype):
    """Whole K fits one tile: no accumulator scratch, no pl.when branches."""
    acc = jnp.dot(
        x_ref[...].astype(compute_dtype),
        w_ref[...].astype(compute_dtype),
        preferred_element_type=jnp.float32,
    )
    o_ref[...] = (acc + b_ref[...].astype(jnp.float32)).astype(o_ref.dtype)


def _decoder_kernel_multi_k(x_ref, w_ref, b_ref, o_ref, acc_ref, *, compute_dtype):
    """K-reduction over grid axis 2 with an f32 VMEM accumulator."""
    k = pl.program_id(2)

    @pl.when(k == 0)
    def _init():
        acc_ref[...] = jnp.zeros_like(acc_ref)

    acc_ref[...] += jnp.dot(
        x_ref[...].astype(compute_dtype),
        w_ref[...].astype(compute_dtype),
        preferred_element_type=jnp.float32,
    )

    @pl.when(k == pl.num_programs(2) - 1)
    def _finalize():
        # Bias added exactly once, after the full K reduction.
        o_ref[...] = (acc_ref[...] + b_ref[...].astype(jnp.float32)).astype(o_ref.dtype)


# ----------------------------------------------------------------------------
# Parameter preparation (do this ONCE, outside the per-step path)
# ----------------------------------------------------------------------------
def pad_decoder_params(weight, bias, *, compute_dtype=jnp.bfloat16):
    """One-time pad (to 128 multiples) + cast of the decoder parameters.

    Returns (weight_padded [Tp, Sp] compute_dtype, bias_padded [Sp] float32).
    Pass them to etp_decoder_forward together with out_features=S.
    """
    T, S = weight.shape
    Tp, Sp = _round_up(T, 128), _round_up(S, 128)
    w_p = weight.astype(compute_dtype)
    if (Tp, Sp) != (T, S):
        w_p = jnp.zeros((Tp, Sp), compute_dtype).at[:T, :S].set(w_p)
    b_p = bias.astype(jnp.float32)
    if Sp != S:
        b_p = jnp.zeros((Sp,), jnp.float32).at[:S].set(b_p)
    return w_p, b_p


# ----------------------------------------------------------------------------
# Forward
# ----------------------------------------------------------------------------
def etp_decoder_forward(
    wubu_tangent_vector,
    weight,
    bias,
    *,
    out_features=None,
    tm: int = 512,
    tn: int = 1024,
    tk: int = 512,
    compute_dtype=jnp.bfloat16,
    out_dtype=None,
    small_size_fallback: bool = True,
    small_flops_cutoff: int = 1 << 22,
):
    """Concrete ETP decoder forward: y = x @ W + b.

    wubu_tangent_vector: [B, T]
    weight:              [Tw, Sw] with Tw >= T, Sw >= out_features (may be the
                         pre-padded output of pad_decoder_params; extra rows
                         are harmless because padded x columns are zero)
    bias:                [Sw] or [Sp]
    returns:             [B, out_features] in out_dtype (default: x.dtype)
    """
    x = wubu_tangent_vector
    B, T = x.shape
    Tw, Sw = weight.shape
    S = Sw if out_features is None else out_features
    assert Tw >= T and Sw >= S, (x.shape, weight.shape, S)
    bias = jnp.reshape(bias, (-1,))
    out_dtype = x.dtype if out_dtype is None else out_dtype

    # Tiny problems: the fixed pallas_call/pipeline overhead dominates — let
    # XLA's fused dot handle it (strictly faster on every generation).
    if small_size_fallback and 2 * B * Tw * Sw < small_flops_cutoff:
        y = jnp.dot(
            x.astype(compute_dtype),
            weight[:T, :S].astype(compute_dtype),
            preferred_element_type=jnp.float32,
        )
        return (y + bias[:S].astype(jnp.float32)).astype(out_dtype)

    # Hardware-friendly (8, 128)-aligned extents.
    Bp = _round_up(B, 8)
    Tp = _round_up(Tw, 128)
    Sp = _round_up(Sw, 128)

    # Tiles must divide the padded dims (no phantom round-up work).
    tm = _fit_tile(Bp, tm, 8)
    tn = _fit_tile(Sp, tn, 128)
    tk = _fit_tile(Tp, tk, 128)

    # x: pad only when required (zero rows/cols are exact for the matmul).
    # The dtype cast happens per-tile inside the kernel, never as an HBM copy.
    if (Bp, Tp) != (B, T):
        x_in = jnp.zeros((Bp, Tp), compute_dtype).at[:B, :T].set(
            x.astype(compute_dtype))
    else:
        x_in = x

    # W: should be pre-padded/cast once via pad_decoder_params; only pad here
    # if the caller passed an unaligned weight.
    if (Tp, Sp) != (Tw, Sw):
        w_in = jnp.zeros((Tp, Sp), compute_dtype).at[:Tw, :Sw].set(
            weight.astype(compute_dtype))
    else:
        w_in = weight

    if bias.shape[0] != Sp:
        b_in = jnp.zeros((1, Sp), jnp.float32).at[0, : bias.shape[0]].set(
            bias.astype(jnp.float32))
    else:
        b_in = bias.reshape(1, Sp)

    gm, gn, gk = Bp // tm, Sp // tn, Tp // tk

    x_item = jnp.dtype(x_in.dtype).itemsize
    w_item = jnp.dtype(w_in.dtype).itemsize
    o_item = jnp.dtype(out_dtype).itemsize
    cost = pl.CostEstimate(
        flops=2 * Bp * Tp * Sp,
        transcendentals=0,
        bytes_accessed=(
            gm * gn * gk * (tm * tk * x_item + tk * tn * w_item)  # streamed x/W tiles
            + gm * gn * (tn * 4 + tm * tn * o_item)               # bias + output
        ),
    )

    out_shape = jax.ShapeDtypeStruct((Bp, Sp), out_dtype)
    dim_sems = ("parallel", "parallel") + (("arbitrary",) if gk > 1 else ())
    compiler_params = pltpu.CompilerParams(
        dimension_semantics=dim_sems,
        vmem_limit_bytes=48 * 1024 * 1024,  # safe under v7x's 64 MiB per-TC VMEM
    )

    if gk == 1:
        # No-reduction fast path: 2-D grid, no f32 scratch.
        out_p = pl.pallas_call(
            functools.partial(_decoder_kernel_single_k, compute_dtype=compute_dtype),
            out_shape=out_shape,
            grid=(gm, gn),
            in_specs=[
                pl.BlockSpec((tm, tk), lambda i, j: (i, 0)),   # x tile
                pl.BlockSpec((tk, tn), lambda i, j: (0, j)),   # W tile
                pl.BlockSpec((1, tn), lambda i, j: (0, j)),    # bias tile
            ],
            out_specs=pl.BlockSpec((tm, tn), lambda i, j: (i, j)),
            compiler_params=compiler_params,
            cost_estimate=cost,
        )(x_in, w_in, b_in)
    else:
        out_p = pl.pallas_call(
            functools.partial(_decoder_kernel_multi_k, compute_dtype=compute_dtype),
            out_shape=out_shape,
            grid=(gm, gn, gk),
            in_specs=[
                pl.BlockSpec((tm, tk), lambda i, j, k: (i, k)),
                pl.BlockSpec((tk, tn), lambda i, j, k: (k, j)),
                pl.BlockSpec((1, tn), lambda i, j, k: (0, j)),
            ],
            out_specs=pl.BlockSpec((tm, tn), lambda i, j, k: (i, j)),
            scratch_shapes=[pltpu.VMEM((tm, tn), jnp.float32)],
            compiler_params=compiler_params,
            cost_estimate=cost,
        )(x_in, w_in, b_in)

    if (Bp, Sp) != (B, S):
        out_p = out_p[:B, :S]
    return out_p


if __name__ == "__main__":
    key = jax.random.PRNGKey(0)
    k1, k2, k3, k4, k5, k6 = jax.random.split(key, 6)

    # ---- Case 1: lane-aligned small shapes --------------------------------
    # Exercises the zero-copy path (no per-call padded copies of x / W) and
    # the single-K-step kernel; parameters padded/cast once, outside the step.
    B1, T1, S1 = 16, 128, 256     # batch, wubu_tangent_dim, source_embedding_dim
    lim1 = 1.0 / (T1 ** 0.5)
    x1 = jax.random.normal(k1, (B1, T1), dtype=jnp.float32)
    w1 = jax.random.uniform(k2, (T1, S1), minval=-lim1, maxval=lim1, dtype=jnp.float32)
    b1 = jax.random.uniform(k3, (S1,), minval=-lim1, maxval=lim1, dtype=jnp.float32)

    w1_p, b1_p = pad_decoder_params(w1, b1)   # once, outside the per-step path
    fwd1 = jax.jit(functools.partial(
        etp_decoder_forward, out_features=S1, small_size_fallback=False))
    y1 = jax.block_until_ready(fwd1(x1, w1_p, b1_p))
    ref1 = x1 @ w1 + b1
    assert y1.shape == (B1, S1), y1.shape
    assert jnp.allclose(y1, ref1, atol=2e-2, rtol=2e-2), (
        float(jnp.max(jnp.abs(y1 - ref1))))

    # ---- Case 2: unaligned small shapes ------------------------------------
    # Exercises the pad + output-slice path with raw (unpadded) parameters.
    B2, T2, S2 = 5, 32, 80
    lim2 = 1.0 / (T2 ** 0.5)
    x2 = jax.random.normal(k4, (B2, T2), dtype=jnp.float32)
    w2 = jax.random.uniform(k5, (T2, S2), minval=-lim2, maxval=lim2, dtype=jnp.float32)
    b2 = jax.random.uniform(k6, (S2,), minval=-lim2, maxval=lim2, dtype=jnp.float32)

    fwd2 = jax.jit(functools.partial(etp_decoder_forward, small_size_fallback=False))
    y2 = jax.block_until_ready(fwd2(x2, w2, b2))
    ref2 = x2 @ w2 + b2
    assert y2.shape == (B2, S2), y2.shape
    assert jnp.allclose(y2, ref2, atol=2e-2, rtol=2e-2), (
        float(jnp.max(jnp.abs(y2 - ref2))))

    # ---- Case 3: tiny-shape XLA fallback (default dispatch) ----------------
    y3 = jax.block_until_ready(jax.jit(etp_decoder_forward)(x2, w2, b2))
    assert jnp.allclose(y3, ref2, atol=2e-2, rtol=2e-2)

    print("KERNEL_OK")
</pallas_src>

<mosaic_0001>
module attributes {stable_mosaic.version = 11 : i64} {
  func.func @_decoder_kernel_single_k(%arg0: i32, %arg1: i32, %arg2: memref<16x128xf32, #tpu.memory_space<vmem>>, %arg3: memref<128x256xbf16, #tpu.memory_space<vmem>>, %arg4: memref<1x256xf32, #tpu.memory_space<vmem>>, %arg5: memref<16x256xf32, #tpu.memory_space<vmem>>) attributes {dimension_semantics = [#tpu.dimension_semantics<parallel>, #tpu.dimension_semantics<parallel>], iteration_bounds = array<i64: 1, 1>, scalar_prefetch = 0 : i64, scratch_operands = 0 : i64, tpu.core_type = #tpu.core_type<tc>, window_params = [{transform_indices = @transform_0, window_bounds = array<i64: 16, 128>}, {transform_indices = @transform_1, window_bounds = array<i64: 128, 256>}, {transform_indices = @transform_2, window_bounds = array<i64: 1, 256>}, {transform_indices = @transform_3, window_bounds = array<i64: 16, 256>}]} {
    %c0 = arith.constant 0 : index
    %c0_0 = arith.constant 0 : index
    %0 = vector.load %arg2[%c0, %c0_0] : memref<16x128xf32, #tpu.memory_space<vmem>>, vector<16x128xf32>
    %1 = arith.truncf %0 : vector<16x128xf32> to vector<16x128xbf16>
    %c0_1 = arith.constant 0 : index
    %c0_2 = arith.constant 0 : index
    %2 = vector.load %arg3[%c0_1, %c0_2] : memref<128x256xbf16, #tpu.memory_space<vmem>>, vector<128x256xbf16>
    %cst = arith.constant dense<0.000000e+00> : vector<16x256xf32>
    %3 = tpu.matmul %1, %2, %cst {dimension_numbers = #tpu.dot_dimension_numbers<[1], [0], [0], [1], [0, 0, 1, 1], [], []>} : vector<16x128xbf16>, vector<128x256xbf16>, vector<16x256xf32> -> vector<16x256xf32>
    %c0_3 = arith.constant 0 : index
    %c0_4 = arith.constant 0 : index
    %4 = vector.load %arg4[%c0_3, %c0_4] : memref<1x256xf32, #tpu.memory_space<vmem>>, vector<1x256xf32>
    %5 = vector.broadcast %4 : vector<1x256xf32> to vector<16x256xf32>
    %6 = arith.addf %3, %5 : vector<16x256xf32>
    %c0_5 = arith.constant 0 : index
    %c0_6 = arith.constant 0 : index
    %7 = vector.load %arg5[%c0_5, %c0_6] : memref<16x256xf32, #tpu.memory_space<vmem>>, vector<16x256xf32>
    tpu.vector_store %arg5[%c0_5, %c0_6], %6 {strides = array<i32>} : memref<16x256xf32, #tpu.memory_space<vmem>>, vector<16x256xf32>,
    return
  }
  func.func @transform_0(%arg0: i32, %arg1: i32) -> (i32, i32) {
    %c0_i32 = arith.constant 0 : i32
    %c0_i32_0 = arith.constant 0 : i32
    return %arg0, %c0_i32 : i32, i32
  }
  func.func @transform_1(%arg0: i32, %arg1: i32) -> (i32, i32) {
    %c0_i32 = arith.constant 0 : i32
    %c0_i32_0 = arith.constant 0 : i32
    return %c0_i32, %arg1 : i32, i32
  }
  func.func @transform_2(%arg0: i32, %arg1: i32) -> (i32, i32) {
    %c0_i32 = arith.constant 0 : i32
    %c0_i32_0 = arith.constant 0 : i32
    return %c0_i32, %arg1 : i32, i32
  }
  func.func @transform_3(%arg0: i32, %arg1: i32) -> (i32, i32) {
    %c0_i32 = arith.constant 0 : i32
    return %arg0, %arg1 : i32, i32
  }
}

</mosaic_0001>

<bundles_post_ra>
// kernel: etp_decoder_forward.1
= control target key start
LH: loop header
LB: loop body
LE: loop exit
PB: predicated region body
PF: predicated region fallthrough
CT: control target
= control target key end

     0   :  { %8 = vsyncpa [#allocation3], 0  ;;  %s408_s0 = inlined_call_operand.hbm [shape: f32[16,128], index: 0, kind: input, shape index: {}]   ;;  %s409_s1 = inlined_call_operand.hbm [shape: bf16[128,256], index: 1, kind: input, shape index: {}]   ;;  %s410_s2 = inlined_call_operand.vmem [shape: f32[1,256], index: 2, kind: input, shape index: {}]   ;;  %s411_s3 = inlined_call_operand.hbm [shape: f32[16,256], index: 3, kind: output, shape index: {}]  }
   0x1   :  { %9 = vsyncpa [#allocation6], 0 }
   0x2   :  { %10 = vsyncpa [#allocation4], 0  ;;  %s15_s14 = sshll.u32 %s408_s0, 4  ;;  %s369_s15 = smov [#allocation2]   ;;  %s16_s14 = int_to_ptr.hbm [resolvable:$true] %s15_s14 }
   0x3   :  { %s17_s16 = sshll.u32 %s369_s15, 4  ;;  %s28_s19 = sshll.u32 %s409_s1, 4  ;;  %s18_s16 = int_to_ptr.vmem [resolvable:$true] %s17_s16  ;;  %s29_s19 = int_to_ptr.hbm [resolvable:$true] %s28_s19 }
   0x4   :  { %s370_s20 = smov 128   ;;  %s371_s21 = smov 8  }
   0x5   :  { %23 = dma.hbm_to_vmem [thread:$0]  %s16_s14, 256, %s18_s16, [#allocation3], %s370_s20, %s370_s20, %s371_s21  }
   0x6   :  { %s372_s22 = smov [#allocation5]  }
   0x7   :  { %s30_s23 = sshll.u32 %s372_s22, 4  ;;  %s31_s23 = int_to_ptr.vmem [resolvable:$true] %s30_s23 }
   0x8   :  { %36 = dma.hbm_to_vmem [thread:$0]  %s29_s19, 2048, %s31_s23, [#allocation6], %s370_s20, %s370_s20, %s371_s21  }
   0x9   :  { %363 = dma.done.wait [#allocation3], 256  }
   0xa   :  { %364 = vsyncadd [#allocation3], 4294967040 }
   0xb   :  { %365 = dma.done.wait [#allocation6], 2048  }
   0xc   :  { %366 = vsyncadd [#allocation6], 4294965248  ;;  %v262_v0 = vld [vmem:[#allocation5 + $0x70] sm:$0xf]  ;;  %v283_v1 = vld [vmem:[#allocation5 + $0x74] sm:$0xf0] }
   0xd   :  { %v282_v2 = vld [vmem:[#allocation5 + $0x74] sm:$0xf]  ;;  %v263_v3 = vor.u32 %v283_v1, %v262_v0  ;;  %v264_v4 = vld [vmem:[#allocation5 + $0x78] sm:$0xf0]  ;;  %v254_v5 = vld [vmem:[#allocation5 + $0x60] sm:$0xf] }
   0xe   :  { %v281_v6 = vld [vmem:[#allocation5 + $0x64] sm:$0xf0]  ;;  %v267_v7 = vor.u32 %v282_v2, %v264_v4  ;;  %v280_v8 = vld [vmem:[#allocation5 + $0x64] sm:$0xf]  ;;  %v256_v9 = vld [vmem:[#allocation5 + $0x68] sm:$0xf0] }
   0xf   :  { %152 = vmatpush.bf16.msra.mxu0 %v263_v3  ;;  %v255_v10 = vor.u32 %v281_v6, %v254_v5  ;;  %v259_v11 = vor.u32 %v280_v8, %v256_v9  ;;  %v246_v12 = vld [vmem:[#allocation5 + $0x50] sm:$0xf]  ;;  %v279_v13 = vld [vmem:[#allocation5 + $0x54] sm:$0xf0]  ;;  %v278_v14 = vld [vmem:[#allocation5 + $0x54] sm:$0xf] }
  0x10   :  { %166 = vmatpush.bf16.msra.mxu1 %v267_v7  ;;  %v248_v15 = vld [vmem:[#allocation5 + $0x58] sm:$0xf0]  ;;  %v247_v16 = vor.u32 %v279_v13, %v246_v12  ;;  %v238_v18 = vld [vmem:[#allocation5 + $0x40] sm:$0xf]  ;;  %v277_v19 = vld [vmem:[#allocation5 + $0x44] sm:$0xf0] }
  0x11   :  { %v251_v17 = vor.u32 %v278_v14, %v248_v15  ;;  %v276_v20 = vld [vmem:[#allocation5 + $0x44] sm:$0xf]  ;;  %v240_v21 = vld [vmem:[#allocation5 + $0x48] sm:$0xf0]  ;;  %v239_v22 = vor.u32 %v277_v19, %v238_v18  ;;  %v230_v24 = vld [vmem:[#allocation5 + $0x30] sm:$0xf] }
  0x12   :  { %v243_v23 = vor.u32 %v276_v20, %v240_v21  ;;  %v275_v25 = vld [vmem:[#allocation5 + $0x34] sm:$0xf0]  ;;  %v274_v26 = vld [vmem:[#allocation5 + $0x34] sm:$0xf]  ;;  %v232_v27 = vld [vmem:[#allocation5 + $0x38] sm:$0xf0] }
  0x13   :  { %153 = vmatpush.bf16.msra.mxu0 %v255_v10  ;;  %v231_v28 = vor.u32 %v275_v25, %v230_v24  ;;  %v235_v29 = vor.u32 %v274_v26, %v232_v27  ;;  %v222_v30 = vld [vmem:[#allocation5 + $0x20] sm:$0xf]  ;;  %v273_v31 = vld [vmem:[#allocation5 + $0x24] sm:$0xf0]  ;;  %v272_v32 = vld [vmem:[#allocation5 + $0x24] sm:$0xf] }
  0x14   :  { %167 = vmatpush.bf16.msra.mxu1 %v259_v11  ;;  %v224_v33 = vld [vmem:[#allocation5 + $0x28] sm:$0xf0]  ;;  %v223_v34 = vor.u32 %v273_v31, %v222_v30  ;;  %v214_v36 = vld [vmem:[#allocation5 + $0x10] sm:$0xf]  ;;  %v271_v37 = vld [vmem:[#allocation5 + $0x14] sm:$0xf0] }
  0x15   :  { %v227_v35 = vor.u32 %v272_v32, %v224_v33  ;;  %v270_v38 = vld [vmem:[#allocation5 + $0x14] sm:$0xf]  ;;  %v216_v39 = vld [vmem:[#allocation5 + $0x18] sm:$0xf0]  ;;  %v215_v40 = vor.u32 %v271_v37, %v214_v36  ;;  %v206_v42 = vld [vmem:[#allocation5] sm:$0xf] }
  0x16   :  { %v219_v41 = vor.u32 %v270_v38, %v216_v39  ;;  %v269_v43 = vld [vmem:[#allocation5 + $0x4] sm:$0xf0]  ;;  %v268_v44 = vld [vmem:[#allocation5 + $0x4] sm:$0xf]  ;;  %v208_v45 = vld [vmem:[#allocation5 + $0x8] sm:$0xf0] }
  0x17   :  { %154 = vmatpush.bf16.msra.mxu0 %v247_v16  ;;  %v207_v46 = vor.u32 %v269_v43, %v206_v42  ;;  %v47_v47 = vld [vmem:[#allocation2] sm:$0xff]  ;;  %v48_v48 = vld [vmem:[#allocation2 + $0x8] sm:$0xff]  ;;  %v211_v49 = vor.u32 %v268_v44, %v208_v45  ;;  %s373_s24 = smov [#allocation7]   ;;  %s190_s28 = sshll.u32 %s411_s3, 4  ;;  %s191_s28 = int_to_ptr.hbm [resolvable:$true] %s190_s28 }
  0x18   :  { %168 = vmatpush.bf16.msra.mxu1 %v251_v17  ;;  %v49_v50 = vpack.c.bf16 %v48_v48, %v47_v47  ;;  %v66_v51 = vld [vmem:[%s410_s2] sm:$0x3]  ;;  %s188_s25 = sshll.u32 %s373_s24, 4  ;;  %s374_s2 = smov 256   ;;  %s189_s25 = int_to_ptr.vmem [resolvable:$true] %s188_s25 }
  0x19   :  { %v68_v52 = vperm.slane %v66_v51, 0  ;;  %v69_v53 = vperm.slane %v66_v51, 1  ;;  %s375_s29 = smov 16  }
  0x1b   :  { %155 = vmatpush.bf16.msra.mxu0 %v239_v22 }
  0x1c   :  { %169 = vmatpush.bf16.msra.mxu1 %v243_v23 }
  0x1f   :  { %156 = vmatpush.bf16.msra.mxu0 %v231_v28 }
  0x20   :  { %170 = vmatpush.bf16.msra.mxu1 %v235_v29 }
  0x23   :  { %157 = vmatpush.bf16.msra.mxu0 %v223_v34 }
  0x24   :  { %171 = vmatpush.bf16.msra.mxu1 %v227_v35 }
  0x27   :  { %158 = vmatpush.bf16.msra.mxu0 %v215_v40 }
  0x28   :  { %172 = vmatpush.bf16.msra.mxu1 %v219_v41 }
  0x2b   :  { %159 = vmatpush.bf16.msra.mxu0 %v207_v46 }
  0x2c   :  { %173 = vmatpush.bf16.msra.mxu1 %v211_v49 }
  0x2e   :  { %160 = vmatmul.bf16.vlgmr.msra.gmra.mxu0 %v49_v50 }
  0x2f   :  { %174 = vmatmul.bf16.vlgmr.msra.gmra.mxu1 %v49_v50 }
  0xab   :  { %v161_v54 = vpop.f32.mrf.mxu0 }
  0xac   :  { %v162_v55 = vadd.f32 %v161_v54, %v68_v52  ;;  %v175_v56 = vpop.f32.mrf.mxu1 }
  0xad   :  { %v176_v57 = vadd.f32 %v175_v56, %v69_v53 }
  0xae   :  { %180 = vst [vmem:[#allocation7] sm:$0xff] %v162_v55 }
  0xaf   :  { %181 = vst [vmem:[#allocation7 + $0x8] sm:$0xff] %v176_v57 }
  0xb3   :  { %v163_v58 = vpop.f32.mrf.mxu0 }
  0xb4   :  { %v164_v59 = vadd.f32 %v163_v58, %v68_v52  ;;  %v177_v60 = vpop.f32.mrf.mxu1 }
  0xb5   :  { %v178_v61 = vadd.f32 %v177_v60, %v69_v53 }
  0xb6   :  { %182 = vst [vmem:[#allocation7 + $0x10] sm:$0xff] %v164_v59 }
  0xb7   :  { %183 = vst [vmem:[#allocation7 + $0x18] sm:$0xff] %v178_v61 }
  0xb8   :  { %196 = dma.vmem_to_hbm [thread:$0]  %s189_s25, 512, %s191_s28, [#allocation4], %s374_s2, %s374_s2, %s375_s29  }
  0xb9   :  { %367 = dma.done.wait [#allocation4], 512  }
  0xba   :  { %368 = vsyncadd [#allocation4], 4294966784 }
  0xbb   :  { %201 = vsyncpa [#allocation3], 1 }
  0xbc   :  { %202 = vsyncpa [#allocation6], 1 }
  0xbd   :  { %203 = vsyncpa [#allocation4], 1 }

</bundles_post_ra>
